<compile_context>
chip_gen: v5e
topology: v5e:2x2
jax: 0.10.0
libtpu: 0.0.40
codegen_flags: <defaults>
</compile_context>

<pallas_src>
import functools

import jax
import jax.numpy as jnp
from jax.experimental import pallas as pl
from jax.experimental.pallas import tpu as pltpu


def _round_up(n, m):
    return ((n + m - 1) // m) * m


def _mlp_kernel(x_ref, w1_ref, b1_ref, w2_ref, b2_ref, o_ref):
    # Hidden layer: h = x @ W1 + b1 (MXU, f32 accumulate; reference module has
    # no activation). Bias add in f32 on the VPU.
    h = jnp.dot(x_ref[...], w1_ref[...], preferred_element_type=jnp.float32)
    h = h + b1_ref[...].astype(jnp.float32)
    # Output layer: y = h @ W2 + b2. Cast h to the weight dtype so bf16
    # weights take the bf16 MXU path (no-op for f32 weights).
    y = jnp.dot(h.astype(w2_ref.dtype), w2_ref[...],
                preferred_element_type=jnp.float32)
    y = y + b2_ref[...].astype(jnp.float32)
    o_ref[...] = y.astype(o_ref.dtype)


@functools.partial(jax.jit, static_argnames=("block_b",))
def mlp_predictor_fused(x, w1, b1, w2, b2, *, block_b=256):
    B, D_in = x.shape
    H = w1.shape[1]
    O = w2.shape[1]

    # MXU / lane-aligned padded sizes.
    Dp = _round_up(D_in, 128)            # K of first matmul
    Hp = _round_up(H, 128)               # N of first / K of second matmul
    Op = _round_up(O, 128)               # lane-dense output store
    TB = min(block_b, _round_up(B, 8))   # batch tile (sublane-aligned)
    Bp = _round_up(B, TB)

    xp = jnp.pad(x, ((0, Bp - B), (0, Dp - D_in)))
    w1p = jnp.pad(w1, ((0, Dp - D_in), (0, Hp - H)))
    b1p = jnp.pad(b1, ((0, 0), (0, Hp - H)))
    w2p = jnp.pad(w2, ((0, Hp - H), (0, Op - O)))
    b2p = jnp.pad(b2, ((0, 0), (0, Op - O)))

    # VMEM budget: double-buffered x/out tiles + (conservatively 2x) resident
    # weights/biases, plus headroom. Capped at 64 MiB = v7x physical VMEM so
    # the same budget is safe on v5e/v6e/v7x.
    x_itm = jnp.dtype(xp.dtype).itemsize
    w_itm = jnp.dtype(w1p.dtype).itemsize
    needed = (2 * (TB * Dp * x_itm + TB * Op * 4)
              + 2 * ((Dp * Hp + Hp * Op) * w_itm + (Hp + Op) * 4))
    vmem_limit = int(min(needed + (4 << 20), 64 << 20))

    # Scheduler hint for XLA around the custom call.
    cost = pl.CostEstimate(
        flops=2 * Bp * (Dp * Hp + Hp * Op),
        transcendentals=0,
        bytes_accessed=(Bp * Dp * x_itm + (Dp * Hp + Hp * Op) * w_itm
                        + (Hp + Op) * 4 + Bp * Op * 4),
    )

    out = pl.pallas_call(
        _mlp_kernel,
        out_shape=jax.ShapeDtypeStruct((Bp, Op), jnp.float32),
        grid=(Bp // TB,),
        in_specs=[
            pl.BlockSpec((TB, Dp), lambda i: (i, 0)),   # x: batch-tiled
            pl.BlockSpec((Dp, Hp), lambda i: (0, 0)),   # w1: VMEM-resident
            pl.BlockSpec((1, Hp), lambda i: (0, 0)),    # b1: resident
            pl.BlockSpec((Hp, Op), lambda i: (0, 0)),   # w2: resident
            pl.BlockSpec((1, Op), lambda i: (0, 0)),    # b2: resident
        ],
        out_specs=pl.BlockSpec((TB, Op), lambda i: (i, 0)),
        compiler_params=pltpu.CompilerParams(
            dimension_semantics=("parallel",),
            vmem_limit_bytes=vmem_limit,
        ),
        cost_estimate=cost,
    )(xp, w1p, b1p, w2p, b2p)
    return out[:B, :O]


def mlp_predictor_forward(x, params, output_dims, compute_dtype=None):
    """Full forward: fused kernel + torch.split-equivalent along dim=1.

    compute_dtype=jnp.bfloat16 halves HBM traffic for x/w1/w2 on v6e/v7x;
    biases and accumulation stay f32.
    """
    w1, b1, w2, b2 = params["w1"], params["b1"], params["w2"], params["b2"]
    if compute_dtype is not None:
        x = x.astype(compute_dtype)
        w1 = w1.astype(compute_dtype)
        w2 = w2.astype(compute_dtype)
    y = mlp_predictor_fused(x, w1, b1, w2, b2)
    outs, off = [], 0
    for d in output_dims:
        outs.append(y[:, off:off + d])
        off += d
    return tuple(outs)


def init_params(key, input_dim, hidden_dim, output_dims):
    """Deterministic init mimicking nn.Linear's U(-1/sqrt(fan_in), +1/sqrt(fan_in))."""
    total_out = sum(output_dims)
    k1, k2, k3, k4 = jax.random.split(key, 4)
    bound1 = 1.0 / (input_dim ** 0.5)
    bound2 = 1.0 / (hidden_dim ** 0.5)
    # Stored as (in, out): transpose of PyTorch's (out, in) weight layout.
    w1 = jax.random.uniform(k1, (input_dim, hidden_dim), jnp.float32,
                            -bound1, bound1)
    b1 = jax.random.uniform(k2, (1, hidden_dim), jnp.float32, -bound1, bound1)
    w2 = jax.random.uniform(k3, (hidden_dim, total_out), jnp.float32,
                            -bound2, bound2)
    b2 = jax.random.uniform(k4, (1, total_out), jnp.float32, -bound2, bound2)
    return {"w1": w1, "b1": b1, "w2": w2, "b2": b2}


if __name__ == "__main__":
    # Module defaults: input_dim=100, hidden_dim=128, output_dims=[1]
    input_dim, hidden_dim, output_dims = 100, 128, [1]
    batch = 8

    key = jax.random.PRNGKey(0)
    kx, kp = jax.random.split(key)
    x = jax.random.normal(kx, (batch, input_dim), jnp.float32)
    params = init_params(kp, input_dim, hidden_dim, output_dims)

    # Reference in plain JAX.
    h_ref = x @ params["w1"] + params["b1"]
    y_ref = h_ref @ params["w2"] + params["b2"]

    # f32 path (exactness check).
    outs = mlp_predictor_forward(x, params, output_dims)
    outs = jax.block_until_ready(outs)
    off = 0
    for o, d in zip(outs, output_dims):
        assert o.shape == (batch, d), o.shape
        assert jnp.allclose(o, y_ref[:, off:off + d], atol=1e-5), "f32 mismatch"
        off += d

    # bf16 weights/activations path (v6e/v7x recommendation), loose tolerance.
    outs_bf16 = mlp_predictor_forward(x, params, output_dims,
                                      compute_dtype=jnp.bfloat16)
    outs_bf16 = jax.block_until_ready(outs_bf16)
    off = 0
    for o, d in zip(outs_bf16, output_dims):
        assert o.shape == (batch, d), o.shape
        assert jnp.allclose(o, y_ref[:, off:off + d], atol=1.5e-1), "bf16 mismatch"
        off += d

    print("KERNEL_OK")
</pallas_src>

<mosaic_0001>
module attributes {stable_mosaic.version = 11 : i64} {
  func.func @_mlp_kernel(%arg0: i32, %arg1: memref<8x128xf32, #tpu.memory_space<vmem>>, %arg2: memref<128x128xf32, #tpu.memory_space<vmem>>, %arg3: memref<1x128xf32, #tpu.memory_space<vmem>>, %arg4: memref<128x128xf32, #tpu.memory_space<vmem>>, %arg5: memref<1x128xf32, #tpu.memory_space<vmem>>, %arg6: memref<8x128xf32, #tpu.memory_space<vmem>>) attributes {dimension_semantics = [#tpu.dimension_semantics<parallel>], iteration_bounds = array<i64: 1>, scalar_prefetch = 0 : i64, scratch_operands = 0 : i64, tpu.core_type = #tpu.core_type<tc>, window_params = [{transform_indices = @transform_0, window_bounds = array<i64: 8, 128>}, {pipeline_mode = #tpu.pipeline_mode<synchronous>, transform_indices = @transform_1, window_bounds = array<i64: 128, 128>}, {pipeline_mode = #tpu.pipeline_mode<synchronous>, transform_indices = @transform_2, window_bounds = array<i64: 1, 128>}, {pipeline_mode = #tpu.pipeline_mode<synchronous>, transform_indices = @transform_3, window_bounds = array<i64: 128, 128>}, {pipeline_mode = #tpu.pipeline_mode<synchronous>, transform_indices = @transform_4, window_bounds = array<i64: 1, 128>}, {transform_indices = @transform_5, window_bounds = array<i64: 8, 128>}]} {
    %c0 = arith.constant 0 : index
    %c0_0 = arith.constant 0 : index
    %0 = vector.load %arg1[%c0, %c0_0] : memref<8x128xf32, #tpu.memory_space<vmem>>, vector<8x128xf32>
    %c0_1 = arith.constant 0 : index
    %c0_2 = arith.constant 0 : index
    %1 = vector.load %arg2[%c0_1, %c0_2] : memref<128x128xf32, #tpu.memory_space<vmem>>, vector<128x128xf32>
    %cst = arith.constant dense<0.000000e+00> : vector<8x128xf32>
    %2 = tpu.matmul %0, %1, %cst {dimension_numbers = #tpu.dot_dimension_numbers<[1], [0], [0], [1], [0, 0, 1, 1], [], []>} : vector<8x128xf32>, vector<128x128xf32>, vector<8x128xf32> -> vector<8x128xf32>
    %c0_3 = arith.constant 0 : index
    %c0_4 = arith.constant 0 : index
    %3 = vector.load %arg3[%c0_3, %c0_4] : memref<1x128xf32, #tpu.memory_space<vmem>>, vector<1x128xf32>
    %4 = vector.broadcast %3 : vector<1x128xf32> to vector<8x128xf32>
    %5 = arith.addf %2, %4 : vector<8x128xf32>
    %c0_5 = arith.constant 0 : index
    %c0_6 = arith.constant 0 : index
    %6 = vector.load %arg4[%c0_5, %c0_6] : memref<128x128xf32, #tpu.memory_space<vmem>>, vector<128x128xf32>
    %cst_7 = arith.constant dense<0.000000e+00> : vector<8x128xf32>
    %7 = tpu.matmul %5, %6, %cst_7 {dimension_numbers = #tpu.dot_dimension_numbers<[1], [0], [0], [1], [0, 0, 1, 1], [], []>} : vector<8x128xf32>, vector<128x128xf32>, vector<8x128xf32> -> vector<8x128xf32>
    %c0_8 = arith.constant 0 : index
    %c0_9 = arith.constant 0 : index
    %8 = vector.load %arg5[%c0_8, %c0_9] : memref<1x128xf32, #tpu.memory_space<vmem>>, vector<1x128xf32>
    %9 = vector.broadcast %8 : vector<1x128xf32> to vector<8x128xf32>
    %10 = arith.addf %7, %9 : vector<8x128xf32>
    %c0_10 = arith.constant 0 : index
    %c0_11 = arith.constant 0 : index
    %11 = vector.load %arg6[%c0_10, %c0_11] : memref<8x128xf32, #tpu.memory_space<vmem>>, vector<8x128xf32>
    tpu.vector_store %arg6[%c0_10, %c0_11], %10 {strides = array<i32>} : memref<8x128xf32, #tpu.memory_space<vmem>>, vector<8x128xf32>,
    return
  }
  func.func @transform_0(%arg0: i32) -> (i32, i32) {
    %c0_i32 = arith.constant 0 : i32
    %c0_i32_0 = arith.constant 0 : i32
    return %arg0, %c0_i32 : i32, i32
  }
  func.func @transform_1(%arg0: i32) -> (i32, i32) {
    %c0_i32 = arith.constant 0 : i32
    %c0_i32_0 = arith.constant 0 : i32
    %c0_i32_1 = arith.constant 0 : i32
    return %c0_i32, %c0_i32_0 : i32, i32
  }
  func.func @transform_2(%arg0: i32) -> (i32, i32) {
    %c0_i32 = arith.constant 0 : i32
    %c0_i32_0 = arith.constant 0 : i32
    %c0_i32_1 = arith.constant 0 : i32
    return %c0_i32, %c0_i32_0 : i32, i32
  }
  func.func @transform_3(%arg0: i32) -> (i32, i32) {
    %c0_i32 = arith.constant 0 : i32
    %c0_i32_0 = arith.constant 0 : i32
    %c0_i32_1 = arith.constant 0 : i32
    return %c0_i32, %c0_i32_0 : i32, i32
  }
  func.func @transform_4(%arg0: i32) -> (i32, i32) {
    %c0_i32 = arith.constant 0 : i32
    %c0_i32_0 = arith.constant 0 : i32
    %c0_i32_1 = arith.constant 0 : i32
    return %c0_i32, %c0_i32_0 : i32, i32
  }
  func.func @transform_5(%arg0: i32) -> (i32, i32) {
    %c0_i32 = arith.constant 0 : i32
    %c0_i32_0 = arith.constant 0 : i32
    return %arg0, %c0_i32 : i32, i32
  }
}

</mosaic_0001>

<bundles_post_ra>
// kernel: mlp_predictor_fused.1
= control target key start
LH: loop header
LB: loop body
LE: loop exit
PB: predicated region body
PF: predicated region fallthrough
CT: control target
= control target key end

     0   :  { %s246_s1 = inlined_call_operand.vmem [shape: f32[128,128], index: 1, kind: input, shape index: {}]   ;;  %s247_s3 = inlined_call_operand.vmem [shape: f32[128,128], index: 3, kind: input, shape index: {}]   ;;  %s248_s2 = inlined_call_operand.vmem [shape: f32[1,128], index: 2, kind: input, shape index: {}]   ;;  %s249_s0 = inlined_call_operand.vmem [shape: f32[8,128], index: 0, kind: input, shape index: {}]   ;;  %s250_s4 = inlined_call_operand.vmem [shape: f32[1,128], index: 4, kind: input, shape index: {}]   ;;  %s251_s5 = inlined_call_operand.vmem [shape: f32[8,128], index: 5, kind: output, shape index: {}]  }
   0x1   :  { %v36_v0 = vld [vmem:[%s246_s1 + $0x78] sm:$0xff]  ;;  %v35_v1 = vld [vmem:[%s246_s1 + $0x70] sm:$0xff]  ;;  %v34_v2 = vld [vmem:[%s246_s1 + $0x68] sm:$0xff] }
   0x2   :  { %41 = vmatpush.msra.mxu0 %v36_v0  ;;  %v33_v3 = vld [vmem:[%s246_s1 + $0x60] sm:$0xff]  ;;  %v76_v4 = vld [vmem:[%s247_s3 + $0x78] sm:$0xff]  ;;  %v75_v6 = vld [vmem:[%s247_s3 + $0x70] sm:$0xff] }
   0x3   :  { %v32_v5 = vld [vmem:[%s246_s1 + $0x58] sm:$0xff]  ;;  %81 = vmatpush.msra.mxu1 %v76_v4  ;;  %v74_v7 = vld [vmem:[%s247_s3 + $0x68] sm:$0xff]  ;;  %v31_v8 = vld [vmem:[%s246_s1 + $0x50] sm:$0xff] }
   0x4   :  { %42 = vmatpush.msra.mxu0 %v35_v1  ;;  %v73_v9 = vld [vmem:[%s247_s3 + $0x60] sm:$0xff]  ;;  %v30_v10 = vld [vmem:[%s246_s1 + $0x48] sm:$0xff]  ;;  %v72_v11 = vld [vmem:[%s247_s3 + $0x58] sm:$0xff] }
   0x5   :  { %82 = vmatpush.msra.mxu1 %v75_v6  ;;  %v29_v12 = vld [vmem:[%s246_s1 + $0x40] sm:$0xff]  ;;  %v71_v13 = vld [vmem:[%s247_s3 + $0x50] sm:$0xff]  ;;  %v28_v14 = vld [vmem:[%s246_s1 + $0x38] sm:$0xff] }
   0x6   :  { %43 = vmatpush.msra.mxu0 %v34_v2  ;;  %v70_v15 = vld [vmem:[%s247_s3 + $0x48] sm:$0xff]  ;;  %v27_v16 = vld [vmem:[%s246_s1 + $0x30] sm:$0xff]  ;;  %v69_v17 = vld [vmem:[%s247_s3 + $0x40] sm:$0xff] }
   0x7   :  { %83 = vmatpush.msra.mxu1 %v74_v7  ;;  %v26_v18 = vld [vmem:[%s246_s1 + $0x28] sm:$0xff]  ;;  %v68_v19 = vld [vmem:[%s247_s3 + $0x38] sm:$0xff]  ;;  %v25_v20 = vld [vmem:[%s246_s1 + $0x20] sm:$0xff] }
   0x8   :  { %44 = vmatpush.msra.mxu0 %v33_v3  ;;  %v67_v21 = vld [vmem:[%s247_s3 + $0x30] sm:$0xff]  ;;  %v24_v22 = vld [vmem:[%s246_s1 + $0x18] sm:$0xff]  ;;  %v66_v23 = vld [vmem:[%s247_s3 + $0x28] sm:$0xff] }
   0x9   :  { %84 = vmatpush.msra.mxu1 %v73_v9  ;;  %v23_v24 = vld [vmem:[%s246_s1 + $0x10] sm:$0xff]  ;;  %v65_v25 = vld [vmem:[%s247_s3 + $0x20] sm:$0xff]  ;;  %v22_v26 = vld [vmem:[%s246_s1 + $0x8] sm:$0xff] }
   0xa   :  { %45 = vmatpush.msra.mxu0 %v32_v5  ;;  %v64_v27 = vld [vmem:[%s247_s3 + $0x18] sm:$0xff]  ;;  %v21_v28 = vld [vmem:[%s246_s1] sm:$0xff]  ;;  %v63_v30 = vld [vmem:[%s247_s3 + $0x10] sm:$0xff] }
   0xb   :  { %85 = vmatpush.msra.mxu1 %v72_v11  ;;  %v20_v29 = vld [vmem:[%s249_s0] sm:$0xff]  ;;  %v62_v31 = vld [vmem:[%s247_s3 + $0x8] sm:$0xff] }
   0xc   :  { %46 = vmatpush.msra.mxu0 %v31_v8  ;;  %v61_v32 = vld [vmem:[%s247_s3] sm:$0xff] }
   0xd   :  { %86 = vmatpush.msra.mxu1 %v71_v13  ;;  %v106_v33 = vld [vmem:[%s248_s2] ss:$0 sm:$0xff] }
   0xe   :  { %47 = vmatpush.msra.mxu0 %v30_v10  ;;  %v107_v36 = vld [vmem:[%s250_s4] ss:$0 sm:$0xff] }
   0xf   :  { %87 = vmatpush.msra.mxu1 %v70_v15 }
  0x10   :  { %48 = vmatpush.msra.mxu0 %v29_v12 }
  0x11   :  { %88 = vmatpush.msra.mxu1 %v69_v17 }
  0x12   :  { %49 = vmatpush.msra.mxu0 %v28_v14 }
  0x13   :  { %89 = vmatpush.msra.mxu1 %v68_v19 }
  0x14   :  { %50 = vmatpush.msra.mxu0 %v27_v16 }
  0x15   :  { %90 = vmatpush.msra.mxu1 %v67_v21 }
  0x16   :  { %51 = vmatpush.msra.mxu0 %v26_v18 }
  0x17   :  { %91 = vmatpush.msra.mxu1 %v66_v23 }
  0x18   :  { %52 = vmatpush.msra.mxu0 %v25_v20 }
  0x19   :  { %92 = vmatpush.msra.mxu1 %v65_v25 }
  0x1a   :  { %53 = vmatpush.msra.mxu0 %v24_v22 }
  0x1b   :  { %93 = vmatpush.msra.mxu1 %v64_v27 }
  0x1c   :  { %54 = vmatpush.msra.mxu0 %v23_v24 }
  0x1d   :  { %94 = vmatpush.msra.mxu1 %v63_v30 }
  0x1e   :  { %55 = vmatpush.msra.mxu0 %v22_v26 }
  0x1f   :  { %95 = vmatpush.msra.mxu1 %v62_v31 }
  0x20   :  { %56 = vmatpush.msra.mxu0 %v21_v28 }
  0x21   :  { %57 = vmatmul.f32.vlgmr.msra.gmra.mxu0 %v20_v29  ;;  %96 = vmatpush.msra.mxu1 %v61_v32 }
  0x9e   :  { %v58_v34 = vpop.f32.mrf.mxu0 }
  0x9f   :  { %v59_v35 = vadd.f32 %v106_v33, %v58_v34 }
  0xa1   :  { %97 = vmatmul.f32.vlgmr.msra.gmra.mxu1 %v59_v35 }
 0x11e   :  { %v98_v37 = vpop.f32.mrf.mxu1 }
 0x11f   :  { %v99_v38 = vadd.f32 %v107_v36, %v98_v37 }
 0x121   :  { %101 = vst [vmem:[%s251_s5] sm:$0xff] %v99_v38 }

</bundles_post_ra>
